<compile_context>
chip_gen: v6e
topology: v6e:2x2x1
jax: 0.10.0
libtpu: 0.0.40
codegen_flags: <defaults>
</compile_context>

<pallas_src>
import jax
import jax.numpy as jnp
from jax import lax
from jax.experimental import pallas as pl
from jax.experimental.pallas import tpu as pltpu

EPS = 1e-5  # nn.BatchNorm2d default


# --------------------------------------------------------------------------
# In-kernel helpers
# --------------------------------------------------------------------------
def _fill_replicate_borders(pad_ref, hi, wi):
    """pad_ref: (n, hi+2, wi+2, c) whose interior [1:hi+1, 1:wi+1] is written.
    Fills the 1-px border with edge replication (PyTorch 'replicate' pad)."""
    pad_ref[:, 0:1, 1:wi + 1, :] = pad_ref[:, 1:2, 1:wi + 1, :]
    pad_ref[:, hi + 1:hi + 2, 1:wi + 1, :] = pad_ref[:, hi:hi + 1, 1:wi + 1, :]
    # Column copies run over the full (already H-padded) row range -> corners OK.
    pad_ref[:, :, 0:1, :] = pad_ref[:, :, 1:2, :]
    pad_ref[:, :, wi + 1:wi + 2, :] = pad_ref[:, :, wi:wi + 1, :]


def _im2col_3x3(pad_ref, im_ref, hi, wi, c):
    """Stage the 9 shifted (n, hi, wi, c) taps into im_ref[..., :9*c]."""
    for k in range(9):
        dy, dx = k // 3, k % 3
        im_ref[:, :, :, k * c:(k + 1) * c] = pad_ref[:, dy:dy + hi, dx:dx + wi, :]


def _bn_relu(y2d, g, b):
    """Training-mode BatchNorm (batch stats, biased var, single pass) + ReLU.
    y2d: (M, C) f32;  g, b: (1, C)."""
    m = y2d.shape[0]
    s1 = jnp.sum(y2d, axis=0, keepdims=True)
    s2 = jnp.sum(y2d * y2d, axis=0, keepdims=True)
    mean = s1 * (1.0 / m)
    var = s2 * (1.0 / m) - mean * mean
    scale = g * lax.rsqrt(var + EPS)
    shift = b - mean * scale
    return jnp.maximum(y2d * scale + shift, 0.0)


# --------------------------------------------------------------------------
# Kernel A: ConvTranspose2d(k=2, s=2) as one matmul (output in block layout)
# --------------------------------------------------------------------------
def _deconv_kernel(x_ref, w_ref, b_ref, o_ref):
    n, h, w, cin = x_ref.shape
    cols = w_ref.shape[-1]                      # 4 * Cout, column order (dy, dx, co)
    x2 = x_ref[...].reshape(n * h * w, cin).astype(jnp.bfloat16)
    y = jnp.dot(x2, w_ref[...], preferred_element_type=jnp.float32) + b_ref[...]
    o_ref[...] = y.reshape(n, h, w, cols)


# --------------------------------------------------------------------------
# Kernel B: replicate-pad + concat + (conv3x3 -> BN -> ReLU) x 2
# --------------------------------------------------------------------------
def _upblock_kernel(up_ref, skip_ref, w1_ref, g1_ref, b1_ref,
                    w2_ref, g2_ref, b2_ref, o_ref,
                    cat_pad, h1_pad, im_ref):
    n, hu, wu, c = up_ref.shape
    c2 = 2 * c
    m = n * hu * wu

    # ---- conv1 input: replicate-padded concat([up, skip]) built in VMEM ----
    cat_pad[:, 1:hu + 1, 1:wu + 1, 0:c] = up_ref[...]
    cat_pad[:, 1:hu + 1, 1:wu + 1, c:c2] = skip_ref[...]
    _fill_replicate_borders(cat_pad, hu, wu)

    # ---- conv1: ONE (M, 9*2C) @ (9*2C, C) bf16 matmul, f32 accumulate ----
    _im2col_3x3(cat_pad, im_ref, hu, wu, c2)
    lhs1 = im_ref[...].reshape(m, 9 * c2).astype(jnp.bfloat16)
    y1 = jnp.dot(lhs1, w1_ref[...], preferred_element_type=jnp.float32)
    h1 = _bn_relu(y1, g1_ref[...], b1_ref[...])

    # ---- conv2 input: replicate-padded hidden activation ----
    h1_pad[:, 1:hu + 1, 1:wu + 1, :] = h1.reshape(n, hu, wu, c)
    _fill_replicate_borders(h1_pad, hu, wu)

    # ---- conv2: ONE (M, 9C) @ (9C, C) bf16 matmul (re-uses im2col scratch) ----
    _im2col_3x3(h1_pad, im_ref, hu, wu, c)
    lhs2 = im_ref[:, :, :, 0:9 * c].reshape(m, 9 * c).astype(jnp.bfloat16)
    y2 = jnp.dot(lhs2, w2_ref[...], preferred_element_type=jnp.float32)
    o_ref[...] = _bn_relu(y2, g2_ref[...], b2_ref[...]).reshape(n, hu, wu, c)


# --------------------------------------------------------------------------
# Wrapper (PyTorch NCHW in / NCHW out)
# --------------------------------------------------------------------------
def _center_crop_nhwc(t, th, tw):
    # torchvision F.center_crop rounding ( (H-h)//2 ) -- even differences here.
    top = (t.shape[1] - th) // 2
    left = (t.shape[2] - tw) // 2
    return t[:, top:top + th, left:left + tw, :]


def up_block_v4(x_nchw, skip_nchw, wt, wt_bias, w1, g1, b1, w2, g2, b2):
    """UpBlock_v4.forward.
    x_nchw:  (N, Cin, H, W)          skip_nchw: (N, Cout, Hs, Ws)
    wt:      (Cin, Cout, 2, 2)       wt_bias: (Cout,)      [ConvTranspose2d layout]
    w1:      (3, 3, 2*Cout, Cout)    w2: (3, 3, Cout, Cout)  [HWIO, bias-free]
    g1,b1,g2,b2: (Cout,)             [BatchNorm affine params]
    """
    n, cin, h, w = x_nchw.shape
    cout = wt.shape[1]
    hu, wu = 2 * h, 2 * w

    x = jnp.transpose(x_nchw, (0, 2, 3, 1)).astype(jnp.float32)       # NCHW -> NHWC
    skip = jnp.transpose(skip_nchw, (0, 2, 3, 1)).astype(jnp.float32)

    vmem = pl.BlockSpec(memory_space=pltpu.MemorySpace.VMEM)

    # --- transposed conv (kernel=stride=2) as a single Pallas matmul ---
    wt_mat = jnp.transpose(wt, (0, 2, 3, 1)).reshape(cin, 4 * cout).astype(jnp.bfloat16)
    bias_row = jnp.tile(wt_bias, 4).reshape(1, 4 * cout).astype(jnp.float32)
    up_blk = pl.pallas_call(
        _deconv_kernel,
        out_shape=jax.ShapeDtypeStruct((n, h, w, 4 * cout), jnp.float32),
        in_specs=[vmem, vmem, vmem],
        out_specs=vmem,
    )(x, wt_mat, bias_row)
    # Sub-pixel (depth-to-space) interleave: one XLA transpose (see TODO above).
    up = up_blk.reshape(n, h, w, 2, 2, cout).transpose(0, 1, 3, 2, 4, 5)
    up = up.reshape(n, hu, wu, cout)

    # --- center-crop the skip connection to the upsampled spatial size ---
    skip_c = _center_crop_nhwc(skip, hu, wu)

    # --- fused conv weights (row order matches the in-kernel im2col order) ---
    w1m = w1.reshape(9 * 2 * cout, cout).astype(jnp.bfloat16)
    w2m = w2.reshape(9 * cout, cout).astype(jnp.bfloat16)
    g1r = g1.reshape(1, cout).astype(jnp.float32)
    b1r = b1.reshape(1, cout).astype(jnp.float32)
    g2r = g2.reshape(1, cout).astype(jnp.float32)
    b2r = b2.reshape(1, cout).astype(jnp.float32)

    out_nhwc = pl.pallas_call(
        _upblock_kernel,
        out_shape=jax.ShapeDtypeStruct((n, hu, wu, cout), jnp.float32),
        in_specs=[vmem] * 8,
        out_specs=vmem,
        scratch_shapes=[
            pltpu.VMEM((n, hu + 2, wu + 2, 2 * cout), jnp.float32),   # padded concat
            pltpu.VMEM((n, hu + 2, wu + 2, cout), jnp.float32),       # padded hidden
            pltpu.VMEM((n, hu, wu, 9 * 2 * cout), jnp.float32),       # im2col (shared)
        ],
    )(up, skip_c, w1m, g1r, b1r, w2m, g2r, b2r)

    return jnp.transpose(out_nhwc, (0, 3, 1, 2))                      # NHWC -> NCHW


# --------------------------------------------------------------------------
# Pure-JAX reference of the PyTorch forward (f32, HIGHEST precision)
# --------------------------------------------------------------------------
def _reference(x_nchw, skip_nchw, wt, wt_bias, w1, g1, b1, w2, g2, b2):
    x = jnp.transpose(x_nchw, (0, 2, 3, 1)).astype(jnp.float32)
    skip = jnp.transpose(skip_nchw, (0, 2, 3, 1)).astype(jnp.float32)
    n, h, w, _ = x.shape
    cout = wt.shape[1]

    up = jnp.einsum('nhwc,copq->nhpwqo', x, wt,
                    precision=lax.Precision.HIGHEST).reshape(n, 2 * h, 2 * w, cout)
    up = up + wt_bias
    skip_c = _center_crop_nhwc(skip, 2 * h, 2 * w)
    cat = jnp.concatenate([up, skip_c], axis=-1)

    def conv_rep(t, wgt):
        tp = jnp.pad(t, ((0, 0), (1, 1), (1, 1), (0, 0)), mode='edge')
        return lax.conv_general_dilated(
            tp, wgt, window_strides=(1, 1), padding='VALID',
            dimension_numbers=('NHWC', 'HWIO', 'NHWC'),
            precision=lax.Precision.HIGHEST)

    def bn_relu(t, g, b):
        mu = jnp.mean(t, axis=(0, 1, 2), keepdims=True)
        var = jnp.mean((t - mu) ** 2, axis=(0, 1, 2), keepdims=True)
        y = (t - mu) * lax.rsqrt(var + EPS) * g.reshape(1, 1, 1, -1) + b.reshape(1, 1, 1, -1)
        return jnp.maximum(y, 0.0)

    h1 = bn_relu(conv_rep(cat, w1), g1, b1)
    h2 = bn_relu(conv_rep(h1, w2), g2, b2)
    return jnp.transpose(h2, (0, 3, 1, 2))


if __name__ == "__main__":
    key = jax.random.PRNGKey(0)
    ks = jax.random.split(key, 10)

    N, Cin, H, W = 2, 4, 16, 16
    Cout = 8

    # Deterministic synthetic inputs / parameters (shapes from UpBlock_v4.__init__).
    x = jax.random.normal(ks[0], (N, Cin, H, W), jnp.float32)
    skip = jax.random.normal(ks[1], (N, Cout, 2 * H + 2, 2 * W + 2), jnp.float32)
    wt = 0.2 * jax.random.normal(ks[2], (Cin, Cout, 2, 2), jnp.float32)     # ConvTranspose2d
    wt_b = 0.1 * jax.random.normal(ks[3], (Cout,), jnp.float32)
    w1 = 0.2 * jax.random.normal(ks[4], (3, 3, 2 * Cout, Cout), jnp.float32)  # HWIO
    w2 = 0.2 * jax.random.normal(ks[5], (3, 3, Cout, Cout), jnp.float32)      # HWIO
    g1 = 1.0 + 0.1 * jax.random.normal(ks[6], (Cout,), jnp.float32)
    b1 = 0.1 * jax.random.normal(ks[7], (Cout,), jnp.float32)
    g2 = 1.0 + 0.1 * jax.random.normal(ks[8], (Cout,), jnp.float32)
    b2 = 0.1 * jax.random.normal(ks[9], (Cout,), jnp.float32)

    out = up_block_v4(x, skip, wt, wt_b, w1, g1, b1, w2, g2, b2)
    out = jax.block_until_ready(out)
    assert out.shape == (N, Cout, 2 * H, 2 * W), out.shape

    ref = _reference(x, skip, wt, wt_b, w1, g1, b1, w2, g2, b2)
    err = float(jnp.max(jnp.abs(out - ref)))
    # Tolerance sized for bf16 MXU operands (8-bit mantissa) vs f32 HIGHEST ref;
    # post-BN outputs are O(1), typical max |err| observed analytically ~1e-2.
    assert err < 5e-2, err

    print("KERNEL_OK")
</pallas_src>

<mosaic_0001>
module attributes {stable_mosaic.version = 11 : i64} {
  func.func @_deconv_kernel(%arg0: memref<2x16x16x4xf32, #tpu.memory_space<vmem>>, %arg1: memref<4x32xbf16, #tpu.memory_space<vmem>>, %arg2: memref<1x32xf32, #tpu.memory_space<vmem>>, %arg3: memref<2x16x16x32xf32, #tpu.memory_space<vmem>>) attributes {dimension_semantics = [], scalar_prefetch = 0 : i64, scratch_operands = 0 : i64, tpu.core_type = #tpu.core_type<tc>} {
    %c0 = arith.constant 0 : index
    %c0_0 = arith.constant 0 : index
    %c0_1 = arith.constant 0 : index
    %c0_2 = arith.constant 0 : index
    %0 = vector.load %arg0[%c0, %c0_0, %c0_1, %c0_2] : memref<2x16x16x4xf32, #tpu.memory_space<vmem>>, vector<2x16x16x4xf32>
    %1 = vector.shape_cast %0 : vector<2x16x16x4xf32> to vector<512x4xf32>
    %2 = arith.truncf %1 : vector<512x4xf32> to vector<512x4xbf16>
    %c0_3 = arith.constant 0 : index
    %c0_4 = arith.constant 0 : index
    %3 = vector.load %arg1[%c0_3, %c0_4] : memref<4x32xbf16, #tpu.memory_space<vmem>>, vector<4x32xbf16>
    %cst = arith.constant dense<0.000000e+00> : vector<512x32xf32>
    %4 = tpu.matmul %2, %3, %cst {dimension_numbers = #tpu.dot_dimension_numbers<[1], [0], [0], [1], [0, 0, 1, 1], [], []>} : vector<512x4xbf16>, vector<4x32xbf16>, vector<512x32xf32> -> vector<512x32xf32>
    %c0_5 = arith.constant 0 : index
    %c0_6 = arith.constant 0 : index
    %5 = vector.load %arg2[%c0_5, %c0_6] : memref<1x32xf32, #tpu.memory_space<vmem>>, vector<1x32xf32>
    %6 = vector.broadcast %5 : vector<1x32xf32> to vector<512x32xf32>
    %7 = arith.addf %4, %6 : vector<512x32xf32>
    %8 = vector.shape_cast %7 : vector<512x32xf32> to vector<2x16x16x32xf32>
    %c0_7 = arith.constant 0 : index
    %c0_8 = arith.constant 0 : index
    %c0_9 = arith.constant 0 : index
    %c0_10 = arith.constant 0 : index
    %9 = vector.load %arg3[%c0_7, %c0_8, %c0_9, %c0_10] : memref<2x16x16x32xf32, #tpu.memory_space<vmem>>, vector<2x16x16x32xf32>
    tpu.vector_store %arg3[%c0_7, %c0_8, %c0_9, %c0_10], %8 {strides = array<i32>} : memref<2x16x16x32xf32, #tpu.memory_space<vmem>>, vector<2x16x16x32xf32>,
    return
  }
}

</mosaic_0001>

<bundles_post_ra>
// kernel: tpu_custom_call.1
= control target key start
LH: loop header
LB: loop body
LE: loop exit
PB: predicated region body
PF: predicated region fallthrough
CT: control target
= control target key end

     0   :  { %vm217_vm0 = vcmask 1041408   ;;  %vm120_vm1 = vcmask 31744   ;;  %s1138_s0 = inlined_call_operand.vmem [shape: f32[2,16,16,4], index: 0, kind: input, shape index: {}]   ;;  %s1139_s1 = inlined_call_operand.vmem [shape: bf16[4,32], index: 1, kind: input, shape index: {}]   ;;  %s1140_s2 = inlined_call_operand.vmem [shape: f32[1,32], index: 2, kind: input, shape index: {}]   ;;  %s1141_s3 = inlined_call_operand.hbm [shape: f32[2,16,16,32], index: 3, kind: output, shape index: {}]  }
   0x1   :  { %v112_v0 = vld [vmem:[%s1139_s1] sm:$0x3]  ;;  %v17_v2 = vld [vmem:[%s1138_s0 + $0x8] sm:$0xff]  ;;  %v18_v7 = vld [vmem:[%s1138_s0 + $0x10] sm:$0xff] }
   0x2   :  { %v16_v1 = vld [vmem:[%s1138_s0] sm:$0xff]  ;;  %725 = vmatprep.subr.msk.bf16.mxu0 %vm217_vm0, %v112_v0  ;;  %726 = vmatprep.subr.msk.bf16.mxu1 %vm217_vm0, %v112_v0  ;;  %v219_v3 = vsel %vm217_vm0, %v112_v0, 0  ;;  %v49_v6 = vld [vmem:[%s1138_s0 + $0x108] sm:$0xff]  ;;  %v19_v9 = vld [vmem:[%s1138_s0 + $0x18] sm:$0xff] }
   0x3   :  { %v80_v4 = vpack.c.bf16 %v17_v2, %v16_v1  ;;  %v48_v5 = vld [vmem:[%s1138_s0 + $0x100] sm:$0xff]  ;;  %658 = vmatpush3.bf16.msra.mxu0 %v219_v3  ;;  %724 = vmatpush3.bf16.msra.mxu1 %v219_v3  ;;  %v50_v10 = vld [vmem:[%s1138_s0 + $0x110] sm:$0xff]  ;;  %v51_v11 = vld [vmem:[%s1138_s0 + $0x118] sm:$0xff]  ;;  %v81_v12 = vpack.c.bf16 %v19_v9, %v18_v7 }
   0x4   :  { %v96_v8 = vpack.c.bf16 %v49_v6, %v48_v5  ;;  %v97_v13 = vpack.c.bf16 %v51_v11, %v50_v10  ;;  %v20_v14 = vld [vmem:[%s1138_s0 + $0x20] sm:$0xff]  ;;  %v21_v15 = vld [vmem:[%s1138_s0 + $0x28] sm:$0xff]  ;;  %v22_v20 = vld [vmem:[%s1138_s0 + $0x30] sm:$0xff] }
   0x5   :  { %659 = vmatprep.mubr.msk.bf16.mxu0 %vm120_vm1, %v80_v4  ;;  %v52_v16 = vld [vmem:[%s1138_s0 + $0x120] sm:$0xff]  ;;  %v82_v17 = vpack.c.bf16 %v21_v15, %v20_v14  ;;  %v53_v18 = vld [vmem:[%s1138_s0 + $0x128] sm:$0xff]  ;;  %v23_v21 = vld [vmem:[%s1138_s0 + $0x38] sm:$0xff] }
   0x6   :  { %691 = vmatprep.mubr.msk.bf16.mxu1 %vm120_vm1, %v96_v8  ;;  %660 = vmatmul.mubr.msk.bf16.vlgmr.msra.gmra.mxu0 %vm120_vm1, %v81_v12  ;;  %v98_v19 = vpack.c.bf16 %v53_v18, %v52_v16  ;;  %v54_v22 = vld [vmem:[%s1138_s0 + $0x130] sm:$0xff]  ;;  %v55_v23 = vld [vmem:[%s1138_s0 + $0x138] sm:$0xff]  ;;  %v24_v24 = vld [vmem:[%s1138_s0 + $0x40] sm:$0xff]  ;;  %v83_v28 = vpack.c.bf16 %v23_v21, %v22_v20 }
   0x7   :  { %692 = vmatmul.mubr.msk.bf16.vlgmr.msra.gmra.mxu1 %vm120_vm1, %v97_v13  ;;  %663 = vmatprep.mubr.msk.bf16.mxu0 %vm120_vm1, %v82_v17  ;;  %v25_v25 = vld [vmem:[%s1138_s0 + $0x48] sm:$0xff]  ;;  %v56_v26 = vld [vmem:[%s1138_s0 + $0x140] sm:$0xff]  ;;  %v99_v29 = vpack.c.bf16 %v55_v23, %v54_v22  ;;  %v26_v32 = vld [vmem:[%s1138_s0 + $0x50] sm:$0xff] }
   0x8   :  { %695 = vmatprep.mubr.msk.bf16.mxu1 %vm120_vm1, %v98_v19  ;;  %v57_v27 = vld [vmem:[%s1138_s0 + $0x148] sm:$0xff]  ;;  %v84_v30 = vpack.c.bf16 %v25_v25, %v24_v24  ;;  %v27_v33 = vld [vmem:[%s1138_s0 + $0x58] sm:$0xff]  ;;  %v58_v34 = vld [vmem:[%s1138_s0 + $0x150] sm:$0xff] }
   0x9   :  { %v100_v31 = vpack.c.bf16 %v57_v27, %v56_v26  ;;  %v59_v35 = vld [vmem:[%s1138_s0 + $0x158] sm:$0xff]  ;;  %v28_v36 = vld [vmem:[%s1138_s0 + $0x60] sm:$0xff]  ;;  %v29_v37 = vld [vmem:[%s1138_s0 + $0x68] sm:$0xff]  ;;  %v85_v40 = vpack.c.bf16 %v27_v33, %v26_v32 }
   0xa   :  { %v60_v38 = vld [vmem:[%s1138_s0 + $0x160] sm:$0xff]  ;;  %v61_v39 = vld [vmem:[%s1138_s0 + $0x168] sm:$0xff]  ;;  %v101_v41 = vpack.c.bf16 %v59_v35, %v58_v34  ;;  %v86_v42 = vpack.c.bf16 %v29_v37, %v28_v36  ;;  %v30_v44 = vld [vmem:[%s1138_s0 + $0x70] sm:$0xff] }
   0xb   :  { %v102_v43 = vpack.c.bf16 %v61_v39, %v60_v38  ;;  %v31_v45 = vld [vmem:[%s1138_s0 + $0x78] sm:$0xff] }
   0xe   :  { %664 = vmatmul.mubr.msk.bf16.gmra.mxu0 %vm120_vm1, %v83_v28 }
   0xf   :  { %696 = vmatmul.mubr.msk.bf16.gmra.mxu1 %vm120_vm1, %v99_v29  ;;  %667 = vmatprep.mubr.msk.bf16.mxu0 %vm120_vm1, %v84_v30 }
  0x10   :  { %699 = vmatprep.mubr.msk.bf16.mxu1 %vm120_vm1, %v100_v31 }
  0x16   :  { %668 = vmatmul.mubr.msk.bf16.gmra.mxu0 %vm120_vm1, %v85_v40 }
  0x17   :  { %700 = vmatmul.mubr.msk.bf16.gmra.mxu1 %vm120_vm1, %v101_v41 }
  0x18   :  { %8 = vsyncpa [#allocation3], 0  ;;  %671 = vmatprep.mubr.msk.bf16.mxu0 %vm120_vm1, %v86_v42  ;;  %703 = vmatprep.mubr.msk.bf16.mxu1 %vm120_vm1, %v102_v43  ;;  %v62_v46 = vld [vmem:[%s1138_s0 + $0x170] sm:$0xff]  ;;  %v63_v47 = vld [vmem:[%s1138_s0 + $0x178] sm:$0xff]  ;;  %v87_v52 = vpack.c.bf16 %v31_v45, %v30_v44  ;;  %vm510_vm2 = vcmask 261120  }
  0x19   :  { %v32_v48 = vld [vmem:[%s1138_s0 + $0x80] sm:$0xff]  ;;  %v33_v49 = vld [vmem:[%s1138_s0 + $0x88] sm:$0xff]  ;;  %v103_v53 = vpack.c.bf16 %v63_v47, %v62_v46  ;;  %v34_v56 = vld [vmem:[%s1138_s0 + $0x90] sm:$0xff] }
  0x1a   :  { %v64_v50 = vld [vmem:[%s1138_s0 + $0x180] sm:$0xff]  ;;  %v65_v51 = vld [vmem:[%s1138_s0 + $0x188] sm:$0xff]  ;;  %v88_v54 = vpack.c.bf16 %v33_v49, %v32_v48  ;;  %v35_v57 = vld [vmem:[%s1138_s0 + $0x98] sm:$0xff] }
  0x1b   :  { %v104_v55 = vpack.c.bf16 %v65_v51, %v64_v50  ;;  %v66_v58 = vld [vmem:[%s1138_s0 + $0x190] sm:$0xff]  ;;  %v67_v59 = vld [vmem:[%s1138_s0 + $0x198] sm:$0xff]  ;;  %v36_v60 = vld [vmem:[%s1138_s0 + $0xa0] sm:$0xff]  ;;  %v89_v0 = vpack.c.bf16 %v35_v57, %v34_v56 }
  0x1c   :  { %v37_v61 = vld [vmem:[%s1138_s0 + $0xa8] sm:$0xff]  ;;  %v68_v62 = vld [vmem:[%s1138_s0 + $0x1a0] sm:$0xff]  ;;  %v105_v1 = vpack.c.bf16 %v67_v59, %v66_v58  ;;  %v38_v4 = vld [vmem:[%s1138_s0 + $0xb0] sm:$0xff] }
  0x1d   :  { %v69_v63 = vld [vmem:[%s1138_s0 + $0x1a8] sm:$0xff]  ;;  %v90_v2 = vpack.c.bf16 %v37_v61, %v36_v60  ;;  %v39_v5 = vld [vmem:[%s1138_s0 + $0xb8] sm:$0xff]  ;;  %v70_v6 = vld [vmem:[%s1138_s0 + $0x1b0] sm:$0xff] }
  0x1e   :  { %672 = vmatmul.mubr.msk.bf16.gmra.mxu0 %vm120_vm1, %v87_v52  ;;  %v106_v3 = vpack.c.bf16 %v69_v63, %v68_v62  ;;  %v71_v7 = vld [vmem:[%s1138_s0 + $0x1b8] sm:$0xff]  ;;  %v40_v8 = vld [vmem:[%s1138_s0 + $0xc0] sm:$0xff]  ;;  %v41_v9 = vld [vmem:[%s1138_s0 + $0xc8] sm:$0xff]  ;;  %v91_v12 = vpack.c.bf16 %v39_v5, %v38_v4 }
  0x1f   :  { %704 = vmatmul.mubr.msk.bf16.gmra.mxu1 %vm120_vm1, %v103_v53  ;;  %675 = vmatprep.mubr.msk.bf16.mxu0 %vm120_vm1, %v88_v54  ;;  %v72_v10 = vld [vmem:[%s1138_s0 + $0x1c0] sm:$0xff]  ;;  %v73_v11 = vld [vmem:[%s1138_s0 + $0x1c8] sm:$0xff]  ;;  %v107_v13 = vpack.c.bf16 %v71_v7, %v70_v6  ;;  %v92_v14 = vpack.c.bf16 %v41_v9, %v40_v8  ;;  %v42_v16 = vld [vmem:[%s1138_s0 + $0xd0] sm:$0xff] }
  0x20   :  { %707 = vmatprep.mubr.msk.bf16.mxu1 %vm120_vm1, %v104_v55  ;;  %v108_v15 = vpack.c.bf16 %v73_v11, %v72_v10  ;;  %v43_v17 = vld [vmem:[%s1138_s0 + $0xd8] sm:$0xff]  ;;  %v74_v18 = vld [vmem:[%s1138_s0 + $0x1d0] sm:$0xff]  ;;  %v44_v20 = vld [vmem:[%s1138_s0 + $0xe0] sm:$0xff] }
  0x21   :  { %v75_v19 = vld [vmem:[%s1138_s0 + $0x1d8] sm:$0xff]  ;;  %v45_v21 = vld [vmem:[%s1138_s0 + $0xe8] sm:$0xff]  ;;  %v76_v22 = vld [vmem:[%s1138_s0 + $0x1e0] sm:$0xff]  ;;  %v93_v24 = vpack.c.bf16 %v43_v17, %v42_v16 }
  0x22   :  { %v77_v23 = vld [vmem:[%s1138_s0 + $0x1e8] sm:$0xff]  ;;  %v109_v25 = vpack.c.bf16 %v75_v19, %v74_v18  ;;  %v94_v26 = vpack.c.bf16 %v45_v21, %v44_v20  ;;  %v46_v28 = vld [vmem:[%s1138_s0 + $0xf0] sm:$0xff]  ;;  %v47_v29 = vld [vmem:[%s1138_s0 + $0xf8] sm:$0xff] }
  0x23   :  { %v110_v27 = vpack.c.bf16 %v77_v23, %v76_v22  ;;  %v78_v30 = vld [vmem:[%s1138_s0 + $0x1f0] sm:$0xff]  ;;  %v79_v31 = vld [vmem:[%s1138_s0 + $0x1f8] sm:$0xff]  ;;  %v95_v32 = vpack.c.bf16 %v47_v29, %v46_v28  ;;  %v1005_v34 = vld [vmem:[%s1140_s2] ss:$0 sm:$0xff]  ;;  %s752_s0 = smov [#allocation2]  }
  0x24   :  { %v111_v33 = vpack.c.bf16 %v79_v31, %v78_v30  ;;  %s580_s2 = sshll.u32 %s752_s0, 4  ;;  %s581_s2 = int_to_ptr.vmem [resolvable:$true] %s580_s2 }
  0x25   :  { %s730_s4 = scalar_lea.vmem %s581_s2, 8192  ;;  %p735_p1 = scmp.lt.s32.totalorder %s581_s2, %s581_s2 }
  0x26   :  { %676 = vmatmul.mubr.msk.bf16.gmra.mxu0 %vm120_vm1, %v89_v0  ;;  %p731_p0 = scmp.ne.s32.totalorder %s581_s2, %s730_s4  ;;  %p736_p2 = scmp.lt.s32.totalorder %s730_s4, %s730_s4 }
  0x27   :  { %708 = vmatmul.mubr.msk.bf16.gmra.mxu1 %vm120_vm1, %v105_v1  ;;  %679 = vmatprep.mubr.msk.bf16.mxu0 %vm120_vm1, %v90_v2 }
  0x28   :  { %711 = vmatprep.mubr.msk.bf16.mxu1 %vm120_vm1, %v106_v3  ;;  %p737_p3 = por %p736_p2, %p735_p1 }
  0x2a   :  { %p738_p4 = pnand %p737_p3, %p731_p0 }
  0x2e   :  { %680 = vmatmul.mubr.msk.bf16.gmra.mxu0 %vm120_vm1, %v91_v12 }
  0x2f   :  { %712 = vmatmul.mubr.msk.bf16.gmra.mxu1 %vm120_vm1, %v107_v13  ;;  %683 = vmatprep.mubr.msk.bf16.mxu0 %vm120_vm1, %v92_v14 }
  0x30   :  { %715 = vmatprep.mubr.msk.bf16.mxu1 %vm120_vm1, %v108_v15 }
  0x36   :  { %684 = vmatmul.mubr.msk.bf16.gmra.mxu0 %vm120_vm1, %v93_v24 }
  0x37   :  { %716 = vmatmul.mubr.msk.bf16.gmra.mxu1 %vm120_vm1, %v109_v25  ;;  %687 = vmatprep.mubr.msk.bf16.mxu0 %vm120_vm1, %v94_v26 }
  0x38   :  { %719 = vmatprep.mubr.msk.bf16.mxu1 %vm120_vm1, %v110_v27 }
  0x3e   :  { %688 = vmatmul.mubr.msk.bf16.gmra.mxu0 %vm120_vm1, %v95_v32 }
  0x3f   :  { %720 = vmatmul.mubr.msk.bf16.gmra.mxu1 %vm120_vm1, %v111_v33 }
  0xc6   :  { %v661_v35 = vpop.f32.mrf.mxu0 }
  0xc7   :  { %v693_v36 = vpop.f32.mrf.mxu1  ;;  %v264_v37 = vadd.f32 %v661_v35, %v1005_v34 }
  0xc8   :  { %v392_v38 = vadd.f32 %v693_v36, %v1005_v34  ;;  %v255_v39 = vpop.f32.mrf.mxu0 }
  0xc9   :  { %v383_v40 = vpop.f32.mrf.mxu1  ;;  %513 = vst.msk [vmem:[#allocation2 + $0x10] sm:$0xff] %vm510_vm2, %v264_v37  ;;  %v256_v41 = vadd.f32 %v1005_v34, %v255_v39 }
  0xca   :  { %545 = vst.msk [vmem:[#allocation2 + $0x110] sm:$0xff] %vm510_vm2, %v392_v38  ;;  %v384_v42 = vadd.f32 %v1005_v34, %v383_v40  ;;  %v662_v43 = vpop.f32.mrf.mxu0 }
  0xcb   :  { %v694_v44 = vpop.f32.mrf.mxu1  ;;  %511 = vst.msk [vmem:[#allocation2] sm:$0xff] %vm510_vm2, %v256_v41  ;;  %v267_v45 = vadd.f32 %v662_v43, %v1005_v34 }
  0xcc   :  { %543 = vst.msk [vmem:[#allocation2 + $0x100] sm:$0xff] %vm510_vm2, %v384_v42  ;;  %v395_v46 = vadd.f32 %v694_v44, %v1005_v34  ;;  %v258_v47 = vpop.f32.mrf.mxu0 }
  0xcd   :  { %v386_v48 = vpop.f32.mrf.mxu1  ;;  %514 = vst.msk [vmem:[#allocation2 + $0x18] sm:$0xff] %vm510_vm2, %v267_v45  ;;  %v259_v49 = vadd.f32 %v1005_v34, %v258_v47 }
  0xce   :  { %546 = vst.msk [vmem:[#allocation2 + $0x118] sm:$0xff] %vm510_vm2, %v395_v46  ;;  %v387_v50 = vadd.f32 %v1005_v34, %v386_v48  ;;  %v665_v51 = vpop.f32.mrf.mxu0 }
  0xcf   :  { %v697_v52 = vpop.f32.mrf.mxu1  ;;  %512 = vst.msk [vmem:[#allocation2 + $0x8] sm:$0xff] %vm510_vm2, %v259_v49  ;;  %v280_v53 = vadd.f32 %v665_v51, %v1005_v34 }
  0xd0   :  { %544 = vst.msk [vmem:[#allocation2 + $0x108] sm:$0xff] %vm510_vm2, %v387_v50  ;;  %v408_v54 = vadd.f32 %v697_v52, %v1005_v34  ;;  %v271_v55 = vpop.f32.mrf.mxu0 }
  0xd1   :  { %v399_v56 = vpop.f32.mrf.mxu1  ;;  %517 = vst.msk [vmem:[#allocation2 + $0x30] sm:$0xff] %vm510_vm2, %v280_v53  ;;  %v272_v57 = vadd.f32 %v1005_v34, %v271_v55 }
  0xd2   :  { %549 = vst.msk [vmem:[#allocation2 + $0x130] sm:$0xff] %vm510_vm2, %v408_v54  ;;  %v400_v58 = vadd.f32 %v1005_v34, %v399_v56  ;;  %v666_v59 = vpop.f32.mrf.mxu0 }
  0xd3   :  { %v698_v60 = vpop.f32.mrf.mxu1  ;;  %515 = vst.msk [vmem:[#allocation2 + $0x20] sm:$0xff] %vm510_vm2, %v272_v57  ;;  %v283_v61 = vadd.f32 %v666_v59, %v1005_v34 }
  0xd4   :  { %547 = vst.msk [vmem:[#allocation2 + $0x120] sm:$0xff] %vm510_vm2, %v400_v58  ;;  %v411_v62 = vadd.f32 %v698_v60, %v1005_v34  ;;  %v274_v63 = vpop.f32.mrf.mxu0 }
  0xd5   :  { %v402_v0 = vpop.f32.mrf.mxu1  ;;  %518 = vst.msk [vmem:[#allocation2 + $0x38] sm:$0xff] %vm510_vm2, %v283_v61  ;;  %v275_v1 = vadd.f32 %v1005_v34, %v274_v63 }
  0xd6   :  { %550 = vst.msk [vmem:[#allocation2 + $0x138] sm:$0xff] %vm510_vm2, %v411_v62  ;;  %v403_v2 = vadd.f32 %v1005_v34, %v402_v0  ;;  %v669_v3 = vpop.f32.mrf.mxu0 }
  0xd7   :  { %v701_v4 = vpop.f32.mrf.mxu1  ;;  %516 = vst.msk [vmem:[#allocation2 + $0x28] sm:$0xff] %vm510_vm2, %v275_v1  ;;  %v296_v5 = vadd.f32 %v669_v3, %v1005_v34 }
  0xd8   :  { %548 = vst.msk [vmem:[#allocation2 + $0x128] sm:$0xff] %vm510_vm2, %v403_v2  ;;  %v424_v6 = vadd.f32 %v701_v4, %v1005_v34  ;;  %v287_v7 = vpop.f32.mrf.mxu0 }
  0xd9   :  { %v415_v8 = vpop.f32.mrf.mxu1  ;;  %521 = vst.msk [vmem:[#allocation2 + $0x50] sm:$0xff] %vm510_vm2, %v296_v5  ;;  %v288_v9 = vadd.f32 %v1005_v34, %v287_v7 }
  0xda   :  { %553 = vst.msk [vmem:[#allocation2 + $0x150] sm:$0xff] %vm510_vm2, %v424_v6  ;;  %v416_v10 = vadd.f32 %v1005_v34, %v415_v8  ;;  %v670_v11 = vpop.f32.mrf.mxu0 }
  0xdb   :  { %v702_v12 = vpop.f32.mrf.mxu1  ;;  %519 = vst.msk [vmem:[#allocation2 + $0x40] sm:$0xff] %vm510_vm2, %v288_v9  ;;  %v299_v13 = vadd.f32 %v670_v11, %v1005_v34 }
  0xdc   :  { %551 = vst.msk [vmem:[#allocation2 + $0x140] sm:$0xff] %vm510_vm2, %v416_v10  ;;  %v427_v14 = vadd.f32 %v702_v12, %v1005_v34  ;;  %v290_v15 = vpop.f32.mrf.mxu0 }
  0xdd   :  { %v418_v16 = vpop.f32.mrf.mxu1  ;;  %522 = vst.msk [vmem:[#allocation2 + $0x58] sm:$0xff] %vm510_vm2, %v299_v13  ;;  %v291_v17 = vadd.f32 %v1005_v34, %v290_v15 }
  0xde   :  { %554 = vst.msk [vmem:[#allocation2 + $0x158] sm:$0xff] %vm510_vm2, %v427_v14  ;;  %v419_v18 = vadd.f32 %v1005_v34, %v418_v16  ;;  %v673_v19 = vpop.f32.mrf.mxu0 }
  0xdf   :  { %v705_v20 = vpop.f32.mrf.mxu1  ;;  %520 = vst.msk [vmem:[#allocation2 + $0x48] sm:$0xff] %vm510_vm2, %v291_v17  ;;  %v312_v21 = vadd.f32 %v673_v19, %v1005_v34 }
  0xe0   :  { %552 = vst.msk [vmem:[#allocation2 + $0x148] sm:$0xff] %vm510_vm2, %v419_v18  ;;  %v440_v22 = vadd.f32 %v705_v20, %v1005_v34  ;;  %v303_v23 = vpop.f32.mrf.mxu0 }
  0xe1   :  { %v431_v24 = vpop.f32.mrf.mxu1  ;;  %525 = vst.msk [vmem:[#allocation2 + $0x70] sm:$0xff] %vm510_vm2, %v312_v21  ;;  %v304_v25 = vadd.f32 %v1005_v34, %v303_v23 }
  0xe2   :  { %557 = vst.msk [vmem:[#allocation2 + $0x170] sm:$0xff] %vm510_vm2, %v440_v22  ;;  %v432_v26 = vadd.f32 %v1005_v34, %v431_v24  ;;  %v674_v27 = vpop.f32.mrf.mxu0 }
  0xe3   :  { %v706_v28 = vpop.f32.mrf.mxu1  ;;  %523 = vst.msk [vmem:[#allocation2 + $0x60] sm:$0xff] %vm510_vm2, %v304_v25  ;;  %v315_v29 = vadd.f32 %v674_v27, %v1005_v34 }
  0xe4   :  { %555 = vst.msk [vmem:[#allocation2 + $0x160] sm:$0xff] %vm510_vm2, %v432_v26  ;;  %v443_v30 = vadd.f32 %v706_v28, %v1005_v34  ;;  %v306_v31 = vpop.f32.mrf.mxu0 }
  0xe5   :  { %v434_v32 = vpop.f32.mrf.mxu1  ;;  %526 = vst.msk [vmem:[#allocation2 + $0x78] sm:$0xff] %vm510_vm2, %v315_v29  ;;  %v307_v33 = vadd.f32 %v1005_v34, %v306_v31 }
  0xe6   :  { %558 = vst.msk [vmem:[#allocation2 + $0x178] sm:$0xff] %vm510_vm2, %v443_v30  ;;  %v435_v35 = vadd.f32 %v1005_v34, %v434_v32  ;;  %v677_v36 = vpop.f32.mrf.mxu0 }
  0xe7   :  { %v709_v37 = vpop.f32.mrf.mxu1  ;;  %524 = vst.msk [vmem:[#allocation2 + $0x68] sm:$0xff] %vm510_vm2, %v307_v33  ;;  %v328_v38 = vadd.f32 %v677_v36, %v1005_v34 }
  0xe8   :  { %556 = vst.msk [vmem:[#allocation2 + $0x168] sm:$0xff] %vm510_vm2, %v435_v35  ;;  %v456_v39 = vadd.f32 %v709_v37, %v1005_v34  ;;  %v319_v40 = vpop.f32.mrf.mxu0 }
  0xe9   :  { %v447_v41 = vpop.f32.mrf.mxu1  ;;  %529 = vst.msk [vmem:[#allocation2 + $0x90] sm:$0xff] %vm510_vm2, %v328_v38  ;;  %v320_v42 = vadd.f32 %v1005_v34, %v319_v40 }
  0xea   :  { %561 = vst.msk [vmem:[#allocation2 + $0x190] sm:$0xff] %vm510_vm2, %v456_v39  ;;  %v448_v43 = vadd.f32 %v1005_v34, %v447_v41  ;;  %v678_v44 = vpop.f32.mrf.mxu0 }
  0xeb   :  { %v710_v45 = vpop.f32.mrf.mxu1  ;;  %527 = vst.msk [vmem:[#allocation2 + $0x80] sm:$0xff] %vm510_vm2, %v320_v42  ;;  %v331_v46 = vadd.f32 %v678_v44, %v1005_v34 }
  0xec   :  { %559 = vst.msk [vmem:[#allocation2 + $0x180] sm:$0xff] %vm510_vm2, %v448_v43  ;;  %v459_v47 = vadd.f32 %v710_v45, %v1005_v34  ;;  %v322_v48 = vpop.f32.mrf.mxu0 }
  0xed   :  { %v450_v49 = vpop.f32.mrf.mxu1  ;;  %530 = vst.msk [vmem:[#allocation2 + $0x98] sm:$0xff] %vm510_vm2, %v331_v46  ;;  %v323_v50 = vadd.f32 %v1005_v34, %v322_v48 }
  0xee   :  { %562 = vst.msk [vmem:[#allocation2 + $0x198] sm:$0xff] %vm510_vm2, %v459_v47  ;;  %v451_v51 = vadd.f32 %v1005_v34, %v450_v49  ;;  %v681_v52 = vpop.f32.mrf.mxu0 }
  0xef   :  { %v713_v53 = vpop.f32.mrf.mxu1  ;;  %528 = vst.msk [vmem:[#allocation2 + $0x88] sm:$0xff] %vm510_vm2, %v323_v50  ;;  %v344_v54 = vadd.f32 %v681_v52, %v1005_v34 }
  0xf0   :  { %560 = vst.msk [vmem:[#allocation2 + $0x188] sm:$0xff] %vm510_vm2, %v451_v51  ;;  %v472_v55 = vadd.f32 %v713_v53, %v1005_v34  ;;  %v335_v56 = vpop.f32.mrf.mxu0 }
  0xf1   :  { %v463_v57 = vpop.f32.mrf.mxu1  ;;  %533 = vst.msk [vmem:[#allocation2 + $0xb0] sm:$0xff] %vm510_vm2, %v344_v54  ;;  %v336_v58 = vadd.f32 %v1005_v34, %v335_v56 }
  0xf2   :  { %565 = vst.msk [vmem:[#allocation2 + $0x1b0] sm:$0xff] %vm510_vm2, %v472_v55  ;;  %v464_v59 = vadd.f32 %v1005_v34, %v463_v57  ;;  %v682_v60 = vpop.f32.mrf.mxu0 }
  0xf3   :  { %v714_v61 = vpop.f32.mrf.mxu1  ;;  %531 = vst.msk [vmem:[#allocation2 + $0xa0] sm:$0xff] %vm510_vm2, %v336_v58  ;;  %v347_v62 = vadd.f32 %v682_v60, %v1005_v34 }
  0xf4   :  { %563 = vst.msk [vmem:[#allocation2 + $0x1a0] sm:$0xff] %vm510_vm2, %v464_v59  ;;  %v475_v63 = vadd.f32 %v714_v61, %v1005_v34  ;;  %v338_v0 = vpop.f32.mrf.mxu0 }
  0xf5   :  { %v466_v1 = vpop.f32.mrf.mxu1  ;;  %534 = vst.msk [vmem:[#allocation2 + $0xb8] sm:$0xff] %vm510_vm2, %v347_v62  ;;  %v339_v2 = vadd.f32 %v1005_v34, %v338_v0 }
  0xf6   :  { %566 = vst.msk [vmem:[#allocation2 + $0x1b8] sm:$0xff] %vm510_vm2, %v475_v63  ;;  %v467_v3 = vadd.f32 %v1005_v34, %v466_v1  ;;  %v685_v4 = vpop.f32.mrf.mxu0 }
  0xf7   :  { %v717_v5 = vpop.f32.mrf.mxu1  ;;  %532 = vst.msk [vmem:[#allocation2 + $0xa8] sm:$0xff] %vm510_vm2, %v339_v2  ;;  %v360_v6 = vadd.f32 %v685_v4, %v1005_v34 }
  0xf8   :  { %564 = vst.msk [vmem:[#allocation2 + $0x1a8] sm:$0xff] %vm510_vm2, %v467_v3  ;;  %v488_v7 = vadd.f32 %v717_v5, %v1005_v34  ;;  %v351_v8 = vpop.f32.mrf.mxu0 }
  0xf9   :  { %v479_v9 = vpop.f32.mrf.mxu1  ;;  %537 = vst.msk [vmem:[#allocation2 + $0xd0] sm:$0xff] %vm510_vm2, %v360_v6  ;;  %v352_v10 = vadd.f32 %v1005_v34, %v351_v8 }
  0xfa   :  { %569 = vst.msk [vmem:[#allocation2 + $0x1d0] sm:$0xff] %vm510_vm2, %v488_v7  ;;  %v480_v11 = vadd.f32 %v1005_v34, %v479_v9  ;;  %v686_v12 = vpop.f32.mrf.mxu0 }
  0xfb   :  { %v718_v13 = vpop.f32.mrf.mxu1  ;;  %535 = vst.msk [vmem:[#allocation2 + $0xc0] sm:$0xff] %vm510_vm2, %v352_v10  ;;  %v363_v14 = vadd.f32 %v686_v12, %v1005_v34 }
  0xfc   :  { %567 = vst.msk [vmem:[#allocation2 + $0x1c0] sm:$0xff] %vm510_vm2, %v480_v11  ;;  %v491_v15 = vadd.f32 %v718_v13, %v1005_v34  ;;  %v354_v16 = vpop.f32.mrf.mxu0 }
  0xfd   :  { %v482_v17 = vpop.f32.mrf.mxu1  ;;  %538 = vst.msk [vmem:[#allocation2 + $0xd8] sm:$0xff] %vm510_vm2, %v363_v14  ;;  %v355_v18 = vadd.f32 %v1005_v34, %v354_v16 }
  0xfe   :  { %570 = vst.msk [vmem:[#allocation2 + $0x1d8] sm:$0xff] %vm510_vm2, %v491_v15  ;;  %v483_v19 = vadd.f32 %v1005_v34, %v482_v17  ;;  %v689_v20 = vpop.f32.mrf.mxu0 }
  0xff   :  { %v721_v21 = vpop.f32.mrf.mxu1  ;;  %536 = vst.msk [vmem:[#allocation2 + $0xc8] sm:$0xff] %vm510_vm2, %v355_v18  ;;  %v376_v22 = vadd.f32 %v689_v20, %v1005_v34 }
 0x100   :  { %568 = vst.msk [vmem:[#allocation2 + $0x1c8] sm:$0xff] %vm510_vm2, %v483_v19  ;;  %v504_v23 = vadd.f32 %v721_v21, %v1005_v34  ;;  %v367_v24 = vpop.f32.mrf.mxu0 }
 0x101   :  { %v495_v25 = vpop.f32.mrf.mxu1  ;;  %541 = vst.msk [vmem:[#allocation2 + $0xf0] sm:$0xff] %vm510_vm2, %v376_v22  ;;  %v368_v26 = vadd.f32 %v1005_v34, %v367_v24 }
 0x102   :  { %573 = vst.msk [vmem:[#allocation2 + $0x1f0] sm:$0xff] %vm510_vm2, %v504_v23  ;;  %v496_v27 = vadd.f32 %v1005_v34, %v495_v25  ;;  %v690_v28 = vpop.f32.mrf.mxu0 }
 0x103   :  { %v722_v29 = vpop.f32.mrf.mxu1  ;;  %539 = vst.msk [vmem:[#allocation2 + $0xe0] sm:$0xff] %vm510_vm2, %v368_v26  ;;  %v379_v30 = vadd.f32 %v690_v28, %v1005_v34 }
 0x104   :  { %571 = vst.msk [vmem:[#allocation2 + $0x1e0] sm:$0xff] %vm510_vm2, %v496_v27  ;;  %v507_v31 = vadd.f32 %v722_v29, %v1005_v34  ;;  %v370_v32 = vpop.f32.mrf.mxu0 }
 0x105   :  { %v498_v33 = vpop.f32.mrf.mxu1  ;;  %542 = vst.msk [vmem:[#allocation2 + $0xf8] sm:$0xff] %vm510_vm2, %v379_v30  ;;  %v371_v35 = vadd.f32 %v1005_v34, %v370_v32 }
 0x106   :  { %574 = vst.msk [vmem:[#allocation2 + $0x1f8] sm:$0xff] %vm510_vm2, %v507_v31  ;;  %v499_v36 = vadd.f32 %v1005_v34, %v498_v33 }
 0x107   :  { %540 = vst.msk [vmem:[#allocation2 + $0xe8] sm:$0xff] %vm510_vm2, %v371_v35 }
 0x108   :  { %572 = vst.msk [vmem:[#allocation2 + $0x1e8] sm:$0xff] %vm510_vm2, %v499_v36 }
 0x109   :  { %741 = shalt.err (!%p738_p4)
}
 0x10a   :  { %s753_s5 = smov 128   ;;  %s754_s6 = smov 8  }
 0x10b   :  { %586 = dma.vmem_to_hbm [thread:$0]  %s581_s2, 8192, %s1141_s3, [#allocation3], %s753_s5, %s753_s5, %s754_s6  }
 0x10c   :  { %750 = dma.done.wait [#allocation3], 8192  }
 0x10d   :  { %751 = vsyncadd [#allocation3], 4294959104 }
 0x10e   :  { %590 = vsyncpa [#allocation3], 1 }

</bundles_post_ra>
